<compile_context>
chip_gen: v6e
topology: v6e:2x2x1
jax: 0.10.0
libtpu: 0.0.40
codegen_flags: <defaults>
</compile_context>

<pallas_src>
import functools

import jax
import jax.numpy as jnp
from jax.experimental import pallas as pl
from jax.experimental.pallas import tpu as pltpu


_ACTIVATIONS = {
    "relu": lambda x: jnp.maximum(x, 0.0),
    "tanh": jnp.tanh,
    "sigmoid": jax.nn.sigmoid,
    "leakyrelu": lambda x: jnp.where(x >= 0, x, 0.01 * x),
    "elu": lambda x: jnp.where(x > 0, x, jnp.expm1(x)),
    "selu": jax.nn.selu,
    "celu": jax.nn.celu,
    "gelu": lambda x: jax.nn.gelu(x, approximate=False),
}
# TODO(synk): 'prelu' (learnable slope) and 'rrelu' (stochastic slope) need extra
# state / in-kernel randomness and are not implemented here.

_TRANSCENDENTAL_ACTS = {"tanh", "sigmoid", "elu", "selu", "celu", "gelu"}

# Batch-tile cap (lanes).  With bf16 inter-layer activations the per-column
# VMEM footprint is ~300-400 B, so a 32K tile is ~10-13 MiB: comfortably inside
# v7x's 64 MiB physical VMEM (and v5e/v6e), while making DMA bursts large
# enough that the ~0.35 us/step grid overhead is negligible.
_MAX_BLOCK_B = 32768


def _mlp_kernel(*refs, act, n_layers, cdt):
    """Fused MLP on one batch tile, transposed (lane-dense) layout.

    refs = (xt_ref, w1_ref, b1_ref, ..., wL_ref, bL_ref, o_ref)
      xt_ref : (H, TB)       activations, batch on lanes, compute dtype
      wl_ref : (out_l, in_l) PyTorch-layout weight (VMEM-resident, constant idx)
      bl_ref : (out_l, 1)    f32 bias, per-sublane constant broadcast on lanes
      o_ref  : (P, TB)
    Matmuls accumulate in f32 on the MXU; the Python loop unrolls at trace time.
    """
    xt_ref = refs[0]
    o_ref = refs[-1]
    wb = refs[1:-1]

    h = xt_ref[...]                                    # (H, TB), compute dtype
    for l in range(n_layers):
        w = wb[2 * l][...]                             # (out, in), compute dtype
        b = wb[2 * l + 1][...]                         # (out, 1), f32
        acc = jnp.dot(w, h, preferred_element_type=jnp.float32) + b
        if l < n_layers - 1:
            # Activation in f32, single cast back to the compute dtype: keeps
            # inter-layer VMEM traffic (and v5e's single vst slot) low.
            h = act(acc).astype(cdt)
        else:
            h = acc
    o_ref[...] = h.astype(o_ref.dtype)


def _jax_mlp(h, params, activation):
    """Plain-XLA fused path (used for small batches and as the reference)."""
    act = _ACTIVATIONS[activation]
    n_layers = len(params) // 2
    for l in range(n_layers):
        w, b = params[2 * l], params[2 * l + 1]
        h = h @ w.T + b
        if l < n_layers - 1:
            h = act(h)
    return h


@functools.partial(
    jax.jit,
    static_argnames=("activation", "compute_dtype", "out_dtype", "block_b",
                     "use_pallas"))
def dense_predictor_forward(x, params, *, activation="relu",
                            compute_dtype=jnp.bfloat16, out_dtype=None,
                            block_b=None, use_pallas=None):
    """x: (B, 1, history_length) -> (B, pred_length). Mirrors DensePredictor.forward.

    compute_dtype: operand dtype fed to the MXU (bf16 default on all chips);
                   accumulation is always f32.
    out_dtype:     kernel output dtype (defaults to x's dtype).
    block_b:       batch tile in lanes (rounded up to a multiple of 128).
    use_pallas:    None -> auto (Pallas only pays off at large batch).
    """
    # NOTE: PyTorch's x.squeeze() drops *all* unit dims; for the intended
    # (B, 1, H) input with B > 1 and H > 1 this equals squeezing axis=1.
    x2d = jnp.squeeze(x, axis=1)
    B, H = x2d.shape
    n_layers = len(params) // 2
    P = params[-2].shape[0]

    if use_pallas is None:
        # Below a few thousand rows the plain fused-XLA path beats the Pallas
        # launch + wrapper layout overhead for this ~KFLOP-per-row MLP.
        use_pallas = B >= 4096
    if not use_pallas:
        return _jax_mlp(x2d, params, activation)

    out_dt = out_dtype if out_dtype is not None else x2d.dtype
    cdt = compute_dtype if compute_dtype is not None else x2d.dtype

    # Lane-dense batch tile: multiple of 128, large enough to amortize per-step
    # overhead, capped for VMEM, and >=2 grid steps at large B so the
    # "parallel" batch axis can shard across v7x's 2 TensorCores.
    if block_b is None:
        block_b = min(_MAX_BLOCK_B, max(128, pl.cdiv(B, 2)))
    block_b = int(-(-int(block_b) // 128) * 128)
    b_pad = pl.cdiv(B, block_b) * block_b
    n_tiles = b_pad // block_b

    # Pad batch, transpose so batch is on the lane axis, cast to compute dtype.
    # Under jit these fuse into a single HBM pass feeding the kernel.
    xt = jnp.pad(x2d, ((0, b_pad - B), (0, 0))).T.astype(cdt)   # (H, b_pad)
    # TODO(synk): the transpose could be removed entirely by DMAing the raw
    # contiguous (B, H) buffer lane-dense and de-interleaving in-kernel with
    # XLU ops (pltpu.roll / strided sublane slices).

    const_map = lambda i: (0, 0)
    operands = [xt]
    in_specs = [pl.BlockSpec((H, block_b), lambda i: (0, i))]
    flops = 0
    weight_bytes = 0
    for l in range(n_layers):
        w = params[2 * l].astype(cdt)                              # (out, in)
        b = params[2 * l + 1].astype(jnp.float32).reshape(-1, 1)   # (out, 1)
        operands += [w, b]
        in_specs += [pl.BlockSpec(w.shape, const_map),
                     pl.BlockSpec(b.shape, const_map)]
        flops += 2 * b_pad * w.shape[0] * w.shape[1]
        weight_bytes += w.size * w.dtype.itemsize + b.size * 4

    hidden_units = sum(params[2 * l].shape[0] for l in range(n_layers - 1))
    transcendentals = (b_pad * hidden_units
                       if activation in _TRANSCENDENTAL_ACTS else 0)
    bytes_accessed = (xt.size * xt.dtype.itemsize
                      + b_pad * P * jnp.dtype(out_dt).itemsize
                      + weight_bytes)

    kernel = functools.partial(
        _mlp_kernel, act=_ACTIVATIONS[activation], n_layers=n_layers, cdt=cdt)

    yt = pl.pallas_call(
        kernel,
        out_shape=jax.ShapeDtypeStruct((P, b_pad), out_dt),
        grid=(n_tiles,),
        in_specs=in_specs,
        out_specs=pl.BlockSpec((P, block_b), lambda i: (0, i)),
        compiler_params=pltpu.CompilerParams(
            dimension_semantics=("parallel",),
            vmem_limit_bytes=48 * 1024 * 1024),
        cost_estimate=pl.CostEstimate(
            flops=flops, transcendentals=transcendentals,
            bytes_accessed=bytes_accessed),
    )(*operands)

    # Back to (B, P); the slice + transpose fuse with the consumer under jit.
    return yt[:, :B].T


def init_params(key, history_length, hiddens, pred_length, dtype=jnp.float32):
    """Deterministic synthetic parameters, PyTorch layout: W=(out,in), b=(out,)."""
    dims = [history_length] + list(hiddens) + [pred_length]
    params = []
    for i in range(len(dims) - 1):
        key, kw, kb = jax.random.split(key, 3)
        bound = 1.0 / (dims[i] ** 0.5)
        w = jax.random.uniform(kw, (dims[i + 1], dims[i]), dtype, -bound, bound)
        b = jax.random.uniform(kb, (dims[i + 1],), dtype, -bound, bound)
        params += [w, b]
    return tuple(params)


def reference_forward(x, params, activation="relu"):
    """Pure-JAX reference of the same MLP."""
    return _jax_mlp(jnp.squeeze(x, axis=1), params, activation)


if __name__ == "__main__":
    # args: history_length=8, hiddens=[32, 32], pred_length=4, activation='relu'
    history_length = 8
    hiddens = [32, 32]
    pred_length = 4
    batch = 2

    key = jax.random.PRNGKey(0)
    key, kx = jax.random.split(key)
    x = jax.random.normal(kx, (batch, 1, history_length), dtype=jnp.float32)
    params = init_params(key, history_length, hiddens, pred_length)

    # Small batch (spec config): force the Pallas path so the kernel runs (the
    # auto-dispatch would hand B=2 to plain XLA); feed f32 operands for an
    # exact comparison against the reference.
    out = dense_predictor_forward(x, params, compute_dtype=jnp.float32,
                                  use_pallas=True)
    out = jax.block_until_ready(out)
    ref = reference_forward(x, params)
    assert out.shape == (batch, pred_length), out.shape
    assert jnp.allclose(out, ref, atol=1e-5, rtol=1e-5), "f32 mismatch vs reference"

    # Larger, non-multiple-of-128 batch: exercises the multi-step "parallel"
    # grid, batch padding, and the default bf16 operand feeding (f32 accum).
    key, kb = jax.random.split(key)
    xb = jax.random.normal(kb, (300, 1, history_length), dtype=jnp.float32)
    out_b = dense_predictor_forward(xb, params, use_pallas=True)
    out_b = jax.block_until_ready(out_b)
    ref_b = reference_forward(xb, params)
    assert out_b.shape == (300, pred_length), out_b.shape
    assert jnp.allclose(out_b, ref_b, atol=5e-2, rtol=5e-2), "bf16 mismatch vs reference"

    print("KERNEL_OK")
</pallas_src>

<mosaic_0001>
module attributes {stable_mosaic.version = 11 : i64} {
  func.func @_mlp_kernel(%arg0: i32, %arg1: memref<8x128xf32, #tpu.memory_space<vmem>>, %arg2: memref<32x8xf32, #tpu.memory_space<vmem>>, %arg3: memref<32x1xf32, #tpu.memory_space<vmem>>, %arg4: memref<32x32xf32, #tpu.memory_space<vmem>>, %arg5: memref<32x1xf32, #tpu.memory_space<vmem>>, %arg6: memref<4x32xf32, #tpu.memory_space<vmem>>, %arg7: memref<4x1xf32, #tpu.memory_space<vmem>>, %arg8: memref<4x128xf32, #tpu.memory_space<vmem>>) attributes {dimension_semantics = [#tpu.dimension_semantics<parallel>], iteration_bounds = array<i64: 1>, scalar_prefetch = 0 : i64, scratch_operands = 0 : i64, tpu.core_type = #tpu.core_type<tc>, window_params = [{transform_indices = @transform_0, window_bounds = array<i64: 8, 128>}, {pipeline_mode = #tpu.pipeline_mode<synchronous>, transform_indices = @transform_1, window_bounds = array<i64: 32, 8>}, {pipeline_mode = #tpu.pipeline_mode<synchronous>, transform_indices = @transform_2, window_bounds = array<i64: 32, 1>}, {pipeline_mode = #tpu.pipeline_mode<synchronous>, transform_indices = @transform_3, window_bounds = array<i64: 32, 32>}, {pipeline_mode = #tpu.pipeline_mode<synchronous>, transform_indices = @transform_4, window_bounds = array<i64: 32, 1>}, {pipeline_mode = #tpu.pipeline_mode<synchronous>, transform_indices = @transform_5, window_bounds = array<i64: 4, 32>}, {pipeline_mode = #tpu.pipeline_mode<synchronous>, transform_indices = @transform_6, window_bounds = array<i64: 4, 1>}, {transform_indices = @transform_7, window_bounds = array<i64: 4, 128>}]} {
    %c0 = arith.constant 0 : index
    %c0_0 = arith.constant 0 : index
    %0 = vector.load %arg1[%c0, %c0_0] : memref<8x128xf32, #tpu.memory_space<vmem>>, vector<8x128xf32>
    %c0_1 = arith.constant 0 : index
    %c0_2 = arith.constant 0 : index
    %1 = vector.load %arg2[%c0_1, %c0_2] : memref<32x8xf32, #tpu.memory_space<vmem>>, vector<32x8xf32>
    %c0_3 = arith.constant 0 : index
    %c0_4 = arith.constant 0 : index
    %2 = vector.load %arg3[%c0_3, %c0_4] : memref<32x1xf32, #tpu.memory_space<vmem>>, vector<32x1xf32>
    %cst = arith.constant dense<0.000000e+00> : vector<32x128xf32>
    %3 = tpu.matmul %1, %0, %cst {dimension_numbers = #tpu.dot_dimension_numbers<[1], [0], [0], [1], [0, 0, 1, 1], [], []>} : vector<32x8xf32>, vector<8x128xf32>, vector<32x128xf32> -> vector<32x128xf32>
    %4 = vector.broadcast %2 : vector<32x1xf32> to vector<32x128xf32>
    %5 = arith.addf %3, %4 : vector<32x128xf32>
    %cst_5 = arith.constant 0.000000e+00 : f32
    %6 = vector.broadcast %cst_5 : f32 to vector<32x128xf32>
    %7 = arith.maximumf %5, %6 : vector<32x128xf32>
    %c0_6 = arith.constant 0 : index
    %c0_7 = arith.constant 0 : index
    %8 = vector.load %arg4[%c0_6, %c0_7] : memref<32x32xf32, #tpu.memory_space<vmem>>, vector<32x32xf32>
    %c0_8 = arith.constant 0 : index
    %c0_9 = arith.constant 0 : index
    %9 = vector.load %arg5[%c0_8, %c0_9] : memref<32x1xf32, #tpu.memory_space<vmem>>, vector<32x1xf32>
    %cst_10 = arith.constant dense<0.000000e+00> : vector<32x128xf32>
    %10 = tpu.matmul %8, %7, %cst_10 {dimension_numbers = #tpu.dot_dimension_numbers<[1], [0], [0], [1], [0, 0, 1, 1], [], []>} : vector<32x32xf32>, vector<32x128xf32>, vector<32x128xf32> -> vector<32x128xf32>
    %11 = vector.broadcast %9 : vector<32x1xf32> to vector<32x128xf32>
    %12 = arith.addf %10, %11 : vector<32x128xf32>
    %cst_11 = arith.constant 0.000000e+00 : f32
    %13 = vector.broadcast %cst_11 : f32 to vector<32x128xf32>
    %14 = arith.maximumf %12, %13 : vector<32x128xf32>
    %c0_12 = arith.constant 0 : index
    %c0_13 = arith.constant 0 : index
    %15 = vector.load %arg6[%c0_12, %c0_13] : memref<4x32xf32, #tpu.memory_space<vmem>>, vector<4x32xf32>
    %c0_14 = arith.constant 0 : index
    %c0_15 = arith.constant 0 : index
    %16 = vector.load %arg7[%c0_14, %c0_15] : memref<4x1xf32, #tpu.memory_space<vmem>>, vector<4x1xf32>
    %cst_16 = arith.constant dense<0.000000e+00> : vector<4x128xf32>
    %17 = tpu.matmul %15, %14, %cst_16 {dimension_numbers = #tpu.dot_dimension_numbers<[1], [0], [0], [1], [0, 0, 1, 1], [], []>} : vector<4x32xf32>, vector<32x128xf32>, vector<4x128xf32> -> vector<4x128xf32>
    %18 = vector.broadcast %16 : vector<4x1xf32> to vector<4x128xf32>
    %19 = arith.addf %17, %18 : vector<4x128xf32>
    %c0_17 = arith.constant 0 : index
    %c0_18 = arith.constant 0 : index
    %20 = vector.load %arg8[%c0_17, %c0_18] : memref<4x128xf32, #tpu.memory_space<vmem>>, vector<4x128xf32>
    tpu.vector_store %arg8[%c0_17, %c0_18], %19 {strides = array<i32>} : memref<4x128xf32, #tpu.memory_space<vmem>>, vector<4x128xf32>,
    return
  }
  func.func @transform_0(%arg0: i32) -> (i32, i32) {
    %c0_i32 = arith.constant 0 : i32
    %c0_i32_0 = arith.constant 0 : i32
    return %c0_i32, %arg0 : i32, i32
  }
  func.func @transform_1(%arg0: i32) -> (i32, i32) {
    %c0_i32 = arith.constant 0 : i32
    %c0_i32_0 = arith.constant 0 : i32
    %c0_i32_1 = arith.constant 0 : i32
    return %c0_i32, %c0_i32_0 : i32, i32
  }
  func.func @transform_2(%arg0: i32) -> (i32, i32) {
    %c0_i32 = arith.constant 0 : i32
    %c0_i32_0 = arith.constant 0 : i32
    %c0_i32_1 = arith.constant 0 : i32
    return %c0_i32, %c0_i32_0 : i32, i32
  }
  func.func @transform_3(%arg0: i32) -> (i32, i32) {
    %c0_i32 = arith.constant 0 : i32
    %c0_i32_0 = arith.constant 0 : i32
    %c0_i32_1 = arith.constant 0 : i32
    return %c0_i32, %c0_i32_0 : i32, i32
  }
  func.func @transform_4(%arg0: i32) -> (i32, i32) {
    %c0_i32 = arith.constant 0 : i32
    %c0_i32_0 = arith.constant 0 : i32
    %c0_i32_1 = arith.constant 0 : i32
    return %c0_i32, %c0_i32_0 : i32, i32
  }
  func.func @transform_5(%arg0: i32) -> (i32, i32) {
    %c0_i32 = arith.constant 0 : i32
    %c0_i32_0 = arith.constant 0 : i32
    %c0_i32_1 = arith.constant 0 : i32
    return %c0_i32, %c0_i32_0 : i32, i32
  }
  func.func @transform_6(%arg0: i32) -> (i32, i32) {
    %c0_i32 = arith.constant 0 : i32
    %c0_i32_0 = arith.constant 0 : i32
    %c0_i32_1 = arith.constant 0 : i32
    return %c0_i32, %c0_i32_0 : i32, i32
  }
  func.func @transform_7(%arg0: i32) -> (i32, i32) {
    %c0_i32 = arith.constant 0 : i32
    %c0_i32_0 = arith.constant 0 : i32
    return %c0_i32, %arg0 : i32, i32
  }
}

</mosaic_0001>

<bundles_post_ra>
// kernel: dense_predictor_forward.1
= control target key start
LH: loop header
LB: loop body
LE: loop exit
PB: predicated region body
PF: predicated region fallthrough
CT: control target
= control target key end

     0   :  { %vm55_vm0 = vcmask 64512   ;;  %v437_v3 = vmov 0   ;;  %vm185_vm1 = vcmask 261120   ;;  %v438_v35 = vmov 0.0   ;;  %s549_s0 = inlined_call_operand.vmem [shape: f32[8,128], index: 0, kind: input, shape index: {}]   ;;  %s550_s1 = inlined_call_operand.vmem [shape: f32[32,8], index: 1, kind: input, shape index: {}]   ;;  %s551_s2 = inlined_call_operand.vmem [shape: f32[32,1], index: 2, kind: input, shape index: {}]   ;;  %s552_s4 = inlined_call_operand.vmem [shape: f32[32,1], index: 4, kind: input, shape index: {}]   ;;  %s553_s6 = inlined_call_operand.vmem [shape: f32[4,1], index: 6, kind: input, shape index: {}]   ;;  %s554_s3 = inlined_call_operand.vmem [shape: f32[32,32], index: 3, kind: input, shape index: {}]   ;;  %s555_s5 = inlined_call_operand.vmem [shape: f32[4,32], index: 5, kind: input, shape index: {}]   ;;  %s556_s7 = inlined_call_operand.vmem [shape: f32[4,128], index: 7, kind: output, shape index: {}]  }
   0x1   :  { %v26_v0 = vld [vmem:[%s549_s0] sm:$0xff]  ;;  %v28_v2 = vld [vmem:[%s550_s1 + $0x8] sm:$0xff]  ;;  %435 = vset.pattern.permute.xlu0 %v437_v3  ;;  %436 = vset.pattern.permute.xlu1 %v437_v3  ;;  %v29_v4 = vld [vmem:[%s550_s1 + $0x10] sm:$0xff]  ;;  %vm439_vm2 = vmmov 0  }
   0x2   :  { %v27_v1 = vld [vmem:[%s550_s1] sm:$0xff]  ;;  %399 = vmatprep.subr.mxu0 %v26_v0  ;;  %v34_v5 = vld [vmem:[%s551_s2 + $0x18] sm:$0xff]  ;;  %v32_v6 = vld [vmem:[%s551_s2 + $0x8] sm:$0xff] }
   0x3   :  { %401 = vmatprep.mubr.msk.f32.mxu0 %vm55_vm0, %v27_v1  ;;  %400 = vmatpush3.msra.mxu0 %v26_v0  ;;  %v33_v7 = vld [vmem:[%s551_s2 + $0x10] sm:$0xff]  ;;  %v30_v8 = vld [vmem:[%s550_s1 + $0x18] sm:$0xff]  ;;  %v31_v9 = vld [vmem:[%s551_s2] sm:$0xff] }
   0x4   :  { %52 = vperm.xlu0 %435, %v34_v5   ;;  %402 = vmatmul.mubr.msk.f32.vlgmr.msra.gmra.mxu0 %vm55_vm0, %v28_v2  ;;  %v164_v10 = vld [vmem:[%s552_s4 + $0x18] sm:$0xff]  ;;  %v163_v11 = vld [vmem:[%s552_s4 + $0x10] sm:$0xff]  ;;  %v162_v12 = vld [vmem:[%s552_s4 + $0x8] sm:$0xff] }
   0x5   :  { %42 = vperm.xlu1 %436, %v32_v6   ;;  %404 = vmatprep.mubr.msk.f32.mxu0 %vm55_vm0, %v29_v4  ;;  %v161_v13 = vld [vmem:[%s552_s4] sm:$0xff]  ;;  %v158_v32 = vld [vmem:[%s554_s3 + $0x8] sm:$0xff]  ;;  %v159_v33 = vld [vmem:[%s554_s3 + $0x10] sm:$0xff] }
   0x6   :  { %v288_v14 = vld [vmem:[%s553_s6] sm:$0xf]  ;;  %v160_v34 = vld [vmem:[%s554_s3 + $0x18] sm:$0xff]  ;;  %421 = vmatprep.subr.mxu0 %v438_v35 }
   0x7   :  { %v157_v15 = vld [vmem:[%s554_s3] sm:$0xff] }
   0x8   :  { %47 = vperm.xlu0 %435, %v33_v7   ;;  %405 = vmatmul.mubr.msk.f32.gmra.mxu0 %vm55_vm0, %v30_v8  ;;  %v287_v52 = vld [vmem:[%s555_s5] sm:$0xf] }
   0x9   :  { %37 = vperm.xlu1 %436, %v31_v9   ;;  %415 = vmatprep.mubr.msk.f32.mxu1 %vm185_vm1, %v157_v15 }
   0xa   :  { %429 = vmatprep.mubr.msk.f32.mxu0 %vm439_vm2, %v438_v35 }
   0xc   :  { %182 = vperm.xlu0 %435, %v164_v10  }
   0xd   :  { %177 = vperm.xlu1 %436, %v163_v11  }
  0x10   :  { %172 = vperm.xlu0 %435, %v162_v12  }
  0x11   :  { %167 = vperm.xlu1 %436, %v161_v13  }
  0x14   :  { %291 = vperm.xlu0 %435, %v288_v14  }
  0x7f   :  { %v53_v16 = vpop.permute.xlu0 %52 }
  0x80   :  { %v43_v18 = vpop.permute.xlu1 %42 }
  0x83   :  { %v48_v22 = vpop.permute.xlu0 %47 }
  0x84   :  { %v38_v27 = vpop.permute.xlu1 %37 }
  0x87   :  { %v183_v36 = vpop.permute.xlu0 %182 }
  0x88   :  { %v178_v38 = vpop.permute.xlu1 %177 }
  0x8b   :  { %v173_v42 = vpop.permute.xlu0 %172 }
  0x8c   :  { %v168_v47 = vpop.permute.xlu1 %167 }
  0x8f   :  { %v292_v53 = vpop.permute.xlu0 %291 }
  0xc4   :  { %v403_v17 = vpop.f32.mrf.mxu0 }
  0xc5   :  { %v140_v24 = vadd.f32 %v403_v17, %v43_v18 }
  0xc6   :  { %v134_v19 = vpop.f32.mrf.mxu0 }
  0xc7   :  { %v135_v28 = vadd.f32 %v134_v19, %v38_v27  ;;  %v154_v30 = vmax.f32 %v140_v24, 0.0 }
  0xc8   :  { %v406_v20 = vpop.f32.mrf.mxu0 }
  0xc9   :  { %v150_v21 = vadd.f32 %v406_v20, %v53_v16  ;;  %v153_v31 = vmax.f32 %v135_v28, 0.0 }
  0xca   :  { %v144_v23 = vpop.f32.mrf.mxu0 }
  0xcb   :  { %v156_v25 = vmax.f32 %v150_v21, 0.0  ;;  %v145_v26 = vadd.f32 %v144_v23, %v48_v22 }
  0xcd   :  { %v155_v29 = vmax.f32 %v145_v26, 0.0  ;;  %407 = vmatprep.subr.mxu1 %v156_v25 }
  0xce   :  { %408 = vmatpush3.msra.mxu1 %v156_v25 }
  0xcf   :  { %409 = vmatprep.subr.mxu1 %v155_v29 }
  0xd0   :  { %410 = vmatpush3.msra.mxu1 %v155_v29 }
  0xd1   :  { %411 = vmatprep.subr.mxu1 %v154_v30 }
  0xd2   :  { %412 = vmatpush3.msra.mxu1 %v154_v30 }
  0xd3   :  { %413 = vmatprep.subr.mxu1 %v153_v31 }
  0xd4   :  { %414 = vmatpush3.msra.mxu1 %v153_v31 }
  0xd5   :  { %416 = vmatmul.mubr.msk.f32.vlgmr.msra.gmra.mxu1 %vm185_vm1, %v158_v32 }
  0xd6   :  { %418 = vmatprep.mubr.msk.f32.mxu1 %vm185_vm1, %v159_v33 }
  0xd9   :  { %419 = vmatmul.mubr.msk.f32.gmra.mxu1 %vm185_vm1, %v160_v34 }
 0x195   :  { %v417_v37 = vpop.f32.mrf.mxu1 }
 0x196   :  { %v270_v44 = vadd.f32 %v417_v37, %v173_v42 }
 0x197   :  { %v264_v39 = vpop.f32.mrf.mxu1 }
 0x198   :  { %v265_v48 = vadd.f32 %v264_v39, %v168_v47  ;;  %v284_v50 = vmax.f32 %v270_v44, 0.0 }
 0x199   :  { %v420_v40 = vpop.f32.mrf.mxu1 }
 0x19a   :  { %v280_v41 = vadd.f32 %v420_v40, %v183_v36  ;;  %v283_v51 = vmax.f32 %v265_v48, 0.0 }
 0x19b   :  { %v274_v43 = vpop.f32.mrf.mxu1 }
 0x19c   :  { %v286_v45 = vmax.f32 %v280_v41, 0.0  ;;  %v275_v46 = vadd.f32 %v274_v43, %v178_v38 }
 0x19e   :  { %v285_v49 = vmax.f32 %v275_v46, 0.0  ;;  %422 = vmatpush3.msra.mxu0 %v286_v45 }
 0x19f   :  { %423 = vmatprep.subr.mxu0 %v438_v35 }
 0x1a0   :  { %424 = vmatpush3.msra.mxu0 %v285_v49 }
 0x1a1   :  { %425 = vmatprep.subr.mxu0 %v438_v35 }
 0x1a2   :  { %426 = vmatpush3.msra.mxu0 %v284_v50 }
 0x1a3   :  { %427 = vmatprep.subr.mxu0 %v438_v35 }
 0x1a4   :  { %428 = vmatpush3.msra.mxu0 %v283_v51 }
 0x1a5   :  { %430 = vmatmul.mubr.msk.f32.vlgmr.msra.gmra.mxu0 %vm185_vm1, %v287_v52 }
 0x265   :  { %v363_v54 = vpop.f32.mrf.mxu0 }
 0x266   :  { %v364_v55 = vadd.f32 %v363_v54, %v292_v53 }
 0x267   :  { %v431_v56 = vpop.f32.mrf.mxu0 }
 0x268   :  { %367 = vst [vmem:[%s556_s7] sm:$0xf] %v364_v55 }

</bundles_post_ra>
